<compile_context>
chip_gen: v7x
topology: tpu7x:2x2x1
jax: 0.10.0
libtpu: 0.0.40
codegen_flags: <defaults>
</compile_context>

<pallas_src>
import numpy as np
import jax
import jax.numpy as jnp
from jax.experimental import pallas as pl
from jax.experimental.pallas import tpu as pltpu


LANE = 128            # TPU lane width: hidden/action weight dims padded to this.
SUBLANE = 8           # Batch tiles must be a multiple of this.
MAX_BLOCK_BATCH = 1024  # Large-batch tile cap (amortizes per-step overhead).


def _round_up(x, m):
    return ((x + m - 1) // m) * m


def actor_kernel(s_ref, w1_ref, b1_ref, w2_ref, b2_ref, w3_ref, b3_ref, out_ref):
    """One batch tile of the fused 3-layer MLP.

    Weights are pre-cast (bf16 by default) and lane-padded with zeros; the
    state tile arrives unpadded [TB, S]. Matmuls accumulate in f32; bias add,
    relu and tanh run in f32. Only the real action lanes are stored.
    """
    cd = w1_ref.dtype                     # MXU operand dtype (pre-cast at init)

    x = s_ref[...].astype(cd)             # (TB, S) streamed tile, one cheap cast

    # fc1 + relu
    h1 = jnp.dot(x, w1_ref[...], preferred_element_type=jnp.float32) + b1_ref[...]
    h1 = jnp.maximum(h1, 0.0)

    # fc2 + relu
    h2 = jnp.dot(h1.astype(cd), w2_ref[...],
                 preferred_element_type=jnp.float32) + b2_ref[...]
    h2 = jnp.maximum(h2, 0.0)

    # fc3 + tanh (drop padded action lanes before the EUP tanh and the store)
    h3 = jnp.dot(h2.astype(cd), w3_ref[...],
                 preferred_element_type=jnp.float32) + b3_ref[...]
    a = out_ref.shape[-1]
    out_ref[...] = jnp.tanh(h3[:, :a])


def actor_forward(state, params, action_size, *, block_batch=None):
    """Runs the fused Actor forward.

    state:  [B, state_size] f32 (unpadded, streamed through VMEM in row tiles).
    params: (w1, b1, w2, b2, w3, b3) from init_actor_params.
    Returns [B, action_size] f32.
    """
    w1, b1, w2, b2, w3, b3 = params
    B, S = state.shape
    assert S == w1.shape[0], "state feature dim must match w1 rows"
    H1 = w1.shape[1]
    H2 = w2.shape[1]
    A_pad = w3.shape[1]

    # Batch tile: >=2 grid steps for medium/large batches (two v7x cores both
    # get work), up to MAX_BLOCK_BATCH rows to amortize per-step overhead.
    if block_batch is None:
        TB = max(SUBLANE, min(MAX_BLOCK_BATCH, _round_up(pl.cdiv(B, 2), SUBLANE)))
    else:
        TB = max(SUBLANE, _round_up(block_batch, SUBLANE))
    grid = (pl.cdiv(B, TB),)               # partial edge block handled by Pallas

    # Weights/biases: constant index_map -> DMA'd once, VMEM-resident.
    const = lambda i: (0, 0)
    in_specs = [
        pl.BlockSpec((TB, S), lambda i: (i, 0)),   # state tile (last dim == full S)
        pl.BlockSpec((S, H1), const),              # w1
        pl.BlockSpec((1, H1), const),              # b1
        pl.BlockSpec((H1, H2), const),             # w2
        pl.BlockSpec((1, H2), const),              # b2
        pl.BlockSpec((H2, A_pad), const),          # w3
        pl.BlockSpec((1, A_pad), const),           # b3
    ]
    out_specs = pl.BlockSpec((TB, action_size), lambda i: (i, 0))

    f32 = jnp.dtype(jnp.float32).itemsize
    wsz = jnp.dtype(w1.dtype).itemsize
    flops = 2 * B * (S * H1 + H1 * H2 + H2 * A_pad)
    bytes_accessed = (f32 * (B * S + B * action_size + H1 + H2 + A_pad)
                      + wsz * (S * H1 + H1 * H2 + H2 * A_pad))
    cost = pl.CostEstimate(flops=flops,
                           transcendentals=B * action_size,
                           bytes_accessed=bytes_accessed)

    return pl.pallas_call(
        actor_kernel,
        out_shape=jax.ShapeDtypeStruct((B, action_size), jnp.float32),
        grid=grid,
        in_specs=in_specs,
        out_specs=out_specs,
        compiler_params=pltpu.CompilerParams(
            dimension_semantics=("parallel",)),
        cost_estimate=cost,
    )(state, w1, b1, w2, b2, w3, b3)


def init_actor_params(key, state_size, action_size, fc1_units, fc2_units,
                      param_dtype=jnp.bfloat16):
    """Init mirroring the torch module's reset_parameters().

    hidden_init() in the reference uses weight.size()[0] (== out_features for
    nn.Linear); we reproduce that limit faithfully. Weights are stored as
    (in_features, out_features) so the kernel does row-major `x @ W`, padded
    with zeros to 128-lane multiples on hidden/action dims (zeros -> results
    on real lanes are unchanged), and pre-cast to `param_dtype` so the kernel
    needs no per-step weight casts. Biases stay f32 (added post-accumulation).
    """
    k1, k2, k3, kb1, kb2, kb3 = jax.random.split(key, 6)

    lim1 = 1.0 / np.sqrt(fc1_units)
    lim2 = 1.0 / np.sqrt(fc2_units)
    lim3 = 3e-3

    w1 = jax.random.uniform(k1, (state_size, fc1_units), jnp.float32, -lim1, lim1)
    w2 = jax.random.uniform(k2, (fc1_units, fc2_units), jnp.float32, -lim2, lim2)
    w3 = jax.random.uniform(k3, (fc2_units, action_size), jnp.float32, -lim3, lim3)

    # nn.Linear default bias init: U(-1/sqrt(in_features), 1/sqrt(in_features))
    bl1 = 1.0 / np.sqrt(state_size)
    bl2 = 1.0 / np.sqrt(fc1_units)
    bl3 = 1.0 / np.sqrt(fc2_units)
    b1 = jax.random.uniform(kb1, (1, fc1_units), jnp.float32, -bl1, bl1)
    b2 = jax.random.uniform(kb2, (1, fc2_units), jnp.float32, -bl2, bl2)
    b3 = jax.random.uniform(kb3, (1, action_size), jnp.float32, -bl3, bl3)

    H1 = _round_up(fc1_units, LANE)
    H2 = _round_up(fc2_units, LANE)
    A = _round_up(action_size, LANE)

    def pad2(a, r, c):
        return jnp.pad(a, ((0, r - a.shape[0]), (0, c - a.shape[1])))

    w1p = pad2(w1, state_size, H1).astype(param_dtype)   # state dim stays unpadded
    w2p = pad2(w2, H1, H2).astype(param_dtype)
    w3p = pad2(w3, H2, A).astype(param_dtype)
    b1p = pad2(b1, 1, H1)
    b2p = pad2(b2, 1, H2)
    b3p = pad2(b3, 1, A)

    return (w1p, b1p, w2p, b2p, w3p, b3p)


def actor_reference(state, params, dims):
    """Pure-JAX reference on the unpadded weight slices, mirroring the
    kernel's operand rounding (bf16 operands, f32 accumulate/epilogue)."""
    state_size, fc1_units, fc2_units, action_size = dims
    w1, b1, w2, b2, w3, b3 = params
    cd = w1.dtype
    up = lambda a: a.astype(jnp.float32)

    w1 = up(w1[:state_size, :fc1_units]); b1 = b1[:, :fc1_units]
    w2 = up(w2[:fc1_units, :fc2_units]); b2 = b2[:, :fc2_units]
    w3 = up(w3[:fc2_units, :action_size]); b3 = b3[:, :action_size]

    x = up(state.astype(cd))
    h = jnp.maximum(x @ w1 + b1, 0.0)
    h = jnp.maximum(up(h.astype(cd)) @ w2 + b2, 0.0)
    return jnp.tanh(up(h.astype(cd)) @ w3 + b3)


if __name__ == "__main__":
    # Small shapes consistent with the module: batch=8, state=24, fc1=64,
    # fc2=48, action=4.
    batch, state_size, action_size = 8, 24, 4
    fc1_units, fc2_units = 64, 48
    dims = (state_size, fc1_units, fc2_units, action_size)

    key = jax.random.PRNGKey(0)
    k_param, k_state = jax.random.split(key)
    state = jax.random.normal(k_state, (batch, state_size), jnp.float32)

    # Default path: bf16 MXU operands, f32 accumulate + f32 epilogue.
    params = init_actor_params(k_param, state_size, action_size,
                               fc1_units, fc2_units)
    out = jax.block_until_ready(actor_forward(state, params, action_size))
    ref = actor_reference(state, params, dims)
    np.testing.assert_allclose(np.asarray(out), np.asarray(ref),
                               rtol=1e-4, atol=1e-4)

    # Pure-f32 path (matches the unpadded f32 math tightly).
    params32 = init_actor_params(k_param, state_size, action_size,
                                 fc1_units, fc2_units,
                                 param_dtype=jnp.float32)
    out32 = jax.block_until_ready(actor_forward(state, params32, action_size))
    ref32 = actor_reference(state, params32, dims)
    np.testing.assert_allclose(np.asarray(out32), np.asarray(ref32),
                               rtol=1e-5, atol=1e-5)

    # Multi-step grid with a partial edge block (B=1030 -> TB=520, 2 steps:
    # exercises the cdiv/edge-masking path and the two-core split sizing).
    big_state = jax.random.normal(jax.random.PRNGKey(1), (1030, state_size),
                                  jnp.float32)
    big_out = jax.block_until_ready(
        actor_forward(big_state, params, action_size))
    big_ref = actor_reference(big_state, params, dims)
    np.testing.assert_allclose(np.asarray(big_out), np.asarray(big_ref),
                               rtol=1e-4, atol=1e-4)

    print("KERNEL_OK")
</pallas_src>

<mosaic_0001>
module attributes {stable_mosaic.version = 11 : i64} {
  func.func @actor_kernel(%arg0: i32, %arg1: memref<8x24xf32, #tpu.memory_space<vmem>>, %arg2: memref<24x128xbf16, #tpu.memory_space<vmem>>, %arg3: memref<1x128xf32, #tpu.memory_space<vmem>>, %arg4: memref<128x128xbf16, #tpu.memory_space<vmem>>, %arg5: memref<1x128xf32, #tpu.memory_space<vmem>>, %arg6: memref<128x128xbf16, #tpu.memory_space<vmem>>, %arg7: memref<1x128xf32, #tpu.memory_space<vmem>>, %arg8: memref<8x4xf32, #tpu.memory_space<vmem>>) attributes {dimension_semantics = [#tpu.dimension_semantics<parallel>], iteration_bounds = array<i64: 1>, scalar_prefetch = 0 : i64, scratch_operands = 0 : i64, tpu.core_type = #tpu.core_type<tc>, window_params = [{transform_indices = @transform_0, window_bounds = array<i64: 8, 24>}, {pipeline_mode = #tpu.pipeline_mode<synchronous>, transform_indices = @transform_1, window_bounds = array<i64: 24, 128>}, {pipeline_mode = #tpu.pipeline_mode<synchronous>, transform_indices = @transform_2, window_bounds = array<i64: 1, 128>}, {pipeline_mode = #tpu.pipeline_mode<synchronous>, transform_indices = @transform_3, window_bounds = array<i64: 128, 128>}, {pipeline_mode = #tpu.pipeline_mode<synchronous>, transform_indices = @transform_4, window_bounds = array<i64: 1, 128>}, {pipeline_mode = #tpu.pipeline_mode<synchronous>, transform_indices = @transform_5, window_bounds = array<i64: 128, 128>}, {pipeline_mode = #tpu.pipeline_mode<synchronous>, transform_indices = @transform_6, window_bounds = array<i64: 1, 128>}, {transform_indices = @transform_7, window_bounds = array<i64: 8, 4>}]} {
    %c0 = arith.constant 0 : index
    %c0_0 = arith.constant 0 : index
    %0 = vector.load %arg1[%c0, %c0_0] : memref<8x24xf32, #tpu.memory_space<vmem>>, vector<8x24xf32>
    %1 = arith.truncf %0 : vector<8x24xf32> to vector<8x24xbf16>
    %c0_1 = arith.constant 0 : index
    %c0_2 = arith.constant 0 : index
    %2 = vector.load %arg2[%c0_1, %c0_2] : memref<24x128xbf16, #tpu.memory_space<vmem>>, vector<24x128xbf16>
    %cst = arith.constant dense<0.000000e+00> : vector<8x128xf32>
    %3 = tpu.matmul %1, %2, %cst {dimension_numbers = #tpu.dot_dimension_numbers<[1], [0], [0], [1], [0, 0, 1, 1], [], []>} : vector<8x24xbf16>, vector<24x128xbf16>, vector<8x128xf32> -> vector<8x128xf32>
    %c0_3 = arith.constant 0 : index
    %c0_4 = arith.constant 0 : index
    %4 = vector.load %arg3[%c0_3, %c0_4] : memref<1x128xf32, #tpu.memory_space<vmem>>, vector<1x128xf32>
    %5 = vector.broadcast %4 : vector<1x128xf32> to vector<8x128xf32>
    %6 = arith.addf %3, %5 : vector<8x128xf32>
    %cst_5 = arith.constant 0.000000e+00 : f32
    %7 = vector.broadcast %cst_5 : f32 to vector<8x128xf32>
    %8 = arith.maximumf %6, %7 : vector<8x128xf32>
    %9 = arith.truncf %8 : vector<8x128xf32> to vector<8x128xbf16>
    %c0_6 = arith.constant 0 : index
    %c0_7 = arith.constant 0 : index
    %10 = vector.load %arg4[%c0_6, %c0_7] : memref<128x128xbf16, #tpu.memory_space<vmem>>, vector<128x128xbf16>
    %cst_8 = arith.constant dense<0.000000e+00> : vector<8x128xf32>
    %11 = tpu.matmul %9, %10, %cst_8 {dimension_numbers = #tpu.dot_dimension_numbers<[1], [0], [0], [1], [0, 0, 1, 1], [], []>} : vector<8x128xbf16>, vector<128x128xbf16>, vector<8x128xf32> -> vector<8x128xf32>
    %c0_9 = arith.constant 0 : index
    %c0_10 = arith.constant 0 : index
    %12 = vector.load %arg5[%c0_9, %c0_10] : memref<1x128xf32, #tpu.memory_space<vmem>>, vector<1x128xf32>
    %13 = vector.broadcast %12 : vector<1x128xf32> to vector<8x128xf32>
    %14 = arith.addf %11, %13 : vector<8x128xf32>
    %cst_11 = arith.constant 0.000000e+00 : f32
    %15 = vector.broadcast %cst_11 : f32 to vector<8x128xf32>
    %16 = arith.maximumf %14, %15 : vector<8x128xf32>
    %17 = arith.truncf %16 : vector<8x128xf32> to vector<8x128xbf16>
    %c0_12 = arith.constant 0 : index
    %c0_13 = arith.constant 0 : index
    %18 = vector.load %arg6[%c0_12, %c0_13] : memref<128x128xbf16, #tpu.memory_space<vmem>>, vector<128x128xbf16>
    %cst_14 = arith.constant dense<0.000000e+00> : vector<8x128xf32>
    %19 = tpu.matmul %17, %18, %cst_14 {dimension_numbers = #tpu.dot_dimension_numbers<[1], [0], [0], [1], [0, 0, 1, 1], [], []>} : vector<8x128xbf16>, vector<128x128xbf16>, vector<8x128xf32> -> vector<8x128xf32>
    %c0_15 = arith.constant 0 : index
    %c0_16 = arith.constant 0 : index
    %20 = vector.load %arg7[%c0_15, %c0_16] : memref<1x128xf32, #tpu.memory_space<vmem>>, vector<1x128xf32>
    %21 = vector.broadcast %20 : vector<1x128xf32> to vector<8x128xf32>
    %22 = arith.addf %19, %21 : vector<8x128xf32>
    %23 = vector.extract_strided_slice %22 {offsets = [0, 0], sizes = [8, 4], strides = [1, 1]} : vector<8x128xf32> to vector<8x4xf32>
    %24 = math.tanh %23 : vector<8x4xf32>
    %c0_17 = arith.constant 0 : index
    %c0_18 = arith.constant 0 : index
    %25 = vector.load %arg8[%c0_17, %c0_18] : memref<8x4xf32, #tpu.memory_space<vmem>>, vector<8x4xf32>
    tpu.vector_store %arg8[%c0_17, %c0_18], %24 {strides = array<i32>} : memref<8x4xf32, #tpu.memory_space<vmem>>, vector<8x4xf32>,
    return
  }
  func.func @transform_0(%arg0: i32) -> (i32, i32) {
    %c0_i32 = arith.constant 0 : i32
    %c0_i32_0 = arith.constant 0 : i32
    return %arg0, %c0_i32 : i32, i32
  }
  func.func @transform_1(%arg0: i32) -> (i32, i32) {
    %c0_i32 = arith.constant 0 : i32
    %c0_i32_0 = arith.constant 0 : i32
    %c0_i32_1 = arith.constant 0 : i32
    return %c0_i32, %c0_i32_0 : i32, i32
  }
  func.func @transform_2(%arg0: i32) -> (i32, i32) {
    %c0_i32 = arith.constant 0 : i32
    %c0_i32_0 = arith.constant 0 : i32
    %c0_i32_1 = arith.constant 0 : i32
    return %c0_i32, %c0_i32_0 : i32, i32
  }
  func.func @transform_3(%arg0: i32) -> (i32, i32) {
    %c0_i32 = arith.constant 0 : i32
    %c0_i32_0 = arith.constant 0 : i32
    %c0_i32_1 = arith.constant 0 : i32
    return %c0_i32, %c0_i32_0 : i32, i32
  }
  func.func @transform_4(%arg0: i32) -> (i32, i32) {
    %c0_i32 = arith.constant 0 : i32
    %c0_i32_0 = arith.constant 0 : i32
    %c0_i32_1 = arith.constant 0 : i32
    return %c0_i32, %c0_i32_0 : i32, i32
  }
  func.func @transform_5(%arg0: i32) -> (i32, i32) {
    %c0_i32 = arith.constant 0 : i32
    %c0_i32_0 = arith.constant 0 : i32
    %c0_i32_1 = arith.constant 0 : i32
    return %c0_i32, %c0_i32_0 : i32, i32
  }
  func.func @transform_6(%arg0: i32) -> (i32, i32) {
    %c0_i32 = arith.constant 0 : i32
    %c0_i32_0 = arith.constant 0 : i32
    %c0_i32_1 = arith.constant 0 : i32
    return %c0_i32, %c0_i32_0 : i32, i32
  }
  func.func @transform_7(%arg0: i32) -> (i32, i32) {
    %c0_i32 = arith.constant 0 : i32
    %c0_i32_0 = arith.constant 0 : i32
    return %arg0, %c0_i32 : i32, i32
  }
}

</mosaic_0001>

<bundles_post_ra>
// kernel: tpu_custom_call.1
= control target key start
LH: loop header
LB: loop body
LE: loop exit
PB: predicated region body
PF: predicated region fallthrough
CT: control target
= control target key end

     0   :  { %12 = vsyncpa [#allocation3], 0  ;;  %s739_s0 = inlined_call_operand.hbm [shape: f32[8,24], index: 0, kind: input, shape index: {}]   ;;  %s740_s1 = inlined_call_operand.hbm [shape: bf16[24,128], index: 1, kind: input, shape index: {}]   ;;  %s741_s2 = inlined_call_operand.vmem [shape: f32[1,128], index: 2, kind: input, shape index: {}]   ;;  %s742_s3 = inlined_call_operand.hbm [shape: bf16[128,128], index: 3, kind: input, shape index: {}]   ;;  %s743_s4 = inlined_call_operand.vmem [shape: f32[1,128], index: 4, kind: input, shape index: {}]   ;;  %s744_s5 = inlined_call_operand.hbm [shape: bf16[128,128], index: 5, kind: input, shape index: {}]   ;;  %s745_s6 = inlined_call_operand.vmem [shape: f32[1,128], index: 6, kind: input, shape index: {}]   ;;  %s746_s7 = inlined_call_operand.vmem [shape: f32[8,4], index: 7, kind: output, shape index: {}]  }
   0x1   :  { %13 = vsyncpa [#allocation5], 0 }
   0x2   :  { %14 = vsyncpa [#allocation8], 0  ;;  %s598_s24 = smov [#allocation4]   ;;  %s504_s28 = scalar_lea.hbm %s740_s1, 192 }
   0x3   :  { %s30_s25 = sshll.u32 %s598_s24, 4  ;;  %p505_p0 = scmp.ne.s32.totalorder %s740_s1, %s504_s28  ;;  %s31_s25 = int_to_ptr.vmem [resolvable:$true] %s30_s25 }
   0x4   :  { %p508_p1 = scmp.lt.u32.totalorder %s504_s28, %s740_s1 }
   0x6   :  { %p510_p2 = pnand %p508_p1, %p505_p0 }
   0x8   :  { %513 = shalt.err (!%p510_p2)
}
   0x9   :  { %s514_s10 = scalar_lea.vmem %s31_s25, 192  ;;  %p519_p4 = scmp.lt.s32.totalorder %s31_s25, %s31_s25 }
   0xa   :  { %p515_p3 = scmp.ne.s32.totalorder %s31_s25, %s514_s10  ;;  %p520_p5 = scmp.lt.s32.totalorder %s514_s10, %s514_s10 }
   0xc   :  { %p521_p6 = por %p520_p5, %p519_p4 }
   0xe   :  { %p522_p7 = pnand %p521_p6, %p515_p3 }
  0x10   :  { %525 = shalt.err (!%p522_p7)
}
  0x11   :  { %s599_s11 = smov 64   ;;  %s600_s12 = smov 4  }
  0x12   :  { %36 = dma.hbm_to_vmem [thread:$0]  %s740_s1, 192, %s31_s25, [#allocation5], %s599_s11, %s599_s11, %s600_s12  }
  0x13   :  { %s601_s15 = smov [#allocation2]   ;;  %s602_s17 = smov [#allocation6]  }
  0x14   :  { %s21_s16 = sshll.u32 %s601_s15, 4  ;;  %s44_s18 = sshll.u32 %s602_s17, 4  ;;  %s22_s16 = int_to_ptr.vmem [resolvable:$true] %s21_s16  ;;  %s45_s18 = int_to_ptr.vmem [resolvable:$true] %s44_s18 }
  0x15   :  { %s526_s21 = scalar_lea.hbm %s739_s0, 128 }
  0x16   :  { %p527_p8 = scmp.ne.s32.totalorder %s739_s0, %s526_s21  ;;  %p530_p9 = scmp.lt.u32.totalorder %s526_s21, %s739_s0 }
  0x18   :  { %p532_p10 = pnand %p530_p9, %p527_p8 }
  0x1a   :  { %535 = shalt.err (!%p532_p10)
}
  0x1b   :  { %s536_s1 = scalar_lea.vmem %s22_s16, 128  ;;  %p541_p12 = scmp.lt.s32.totalorder %s22_s16, %s22_s16 }
  0x1c   :  { %p537_p11 = scmp.ne.s32.totalorder %s22_s16, %s536_s1  ;;  %p542_p13 = scmp.lt.s32.totalorder %s536_s1, %s536_s1 }
  0x1e   :  { %p543_p0 = por %p542_p13, %p541_p12 }
  0x20   :  { %p544_p1 = pnand %p543_p0, %p537_p11 }
  0x22   :  { %547 = shalt.err (!%p544_p1)
}
  0x23   :  { %24 = dma.hbm_to_vmem [thread:$0]  %s739_s0, 128, %s22_s16, [#allocation3]  }
  0x24   :  { %s548_s30 = scalar_lea.hbm %s742_s3, 1024 }
  0x25   :  { %p549_p2 = scmp.ne.s32.totalorder %s742_s3, %s548_s30  ;;  %p552_p3 = scmp.lt.u32.totalorder %s548_s30, %s742_s3 }
  0x27   :  { %p554_p4 = pnand %p552_p3, %p549_p2 }
  0x29   :  { %557 = shalt.err (!%p554_p4)
}
  0x2a   :  { %s558_s14 = scalar_lea.vmem %s45_s18, 1024  ;;  %p563_p6 = scmp.lt.s32.totalorder %s45_s18, %s45_s18 }
  0x2b   :  { %p559_p5 = scmp.ne.s32.totalorder %s45_s18, %s558_s14  ;;  %p564_p7 = scmp.lt.s32.totalorder %s558_s14, %s558_s14 }
  0x2d   :  { %p565_p8 = por %p564_p7, %p563_p6 }
  0x2f   :  { %p566_p9 = pnand %p565_p8, %p559_p5 }
  0x31   :  { %569 = shalt.err (!%p566_p9)
}
  0x32   :  { %50 = dma.hbm_to_vmem [thread:$0]  %s742_s3, 1024, %s45_s18, [#allocation5], %s599_s11, %s599_s11, %s600_s12  }
  0x33   :  { %s603_s16 = smov [#allocation7]   ;;  %s570_s21 = scalar_lea.hbm %s744_s5, 1024 }
  0x34   :  { %s58_s17 = sshll.u32 %s603_s16, 4  ;;  %p571_p10 = scmp.ne.s32.totalorder %s744_s5, %s570_s21  ;;  %s59_s17 = int_to_ptr.vmem [resolvable:$true] %s58_s17 }
  0x35   :  { %p574_p11 = scmp.lt.u32.totalorder %s570_s21, %s744_s5 }
  0x37   :  { %p576_p12 = pnand %p574_p11, %p571_p10 }
  0x39   :  { %579 = shalt.err (!%p576_p12)
}
  0x3a   :  { %s580_s1 = scalar_lea.vmem %s59_s17, 1024  ;;  %p585_p0 = scmp.lt.s32.totalorder %s59_s17, %s59_s17 }
  0x3b   :  { %p581_p13 = scmp.ne.s32.totalorder %s59_s17, %s580_s1  ;;  %p586_p1 = scmp.lt.s32.totalorder %s580_s1, %s580_s1 }
  0x3d   :  { %p587_p2 = por %p586_p1, %p585_p0 }
  0x3f   :  { %p588_p3 = pnand %p587_p2, %p581_p13 }
  0x41   :  { %591 = shalt.err (!%p588_p3)
}
  0x42   :  { %64 = dma.hbm_to_vmem [thread:$0]  %s744_s5, 1024, %s59_s17, [#allocation8], %s599_s11, %s599_s11, %s600_s12  }
  0x43   :  { %592 = dma.done.wait [#allocation3], 128  }
  0x44   :  { %593 = vsyncadd [#allocation3], 4294967168 }
  0x45   :  { %594 = dma.done.wait [#allocation5], 1216  }
  0x46   :  { %595 = vsyncadd [#allocation5], 4294966080 }
  0x47   :  { %596 = dma.done.wait [#allocation8], 1024  }
  0x48   :  { %597 = vsyncadd [#allocation8], 4294966272  ;;  %v604_v0 = vmov 0.0   ;;  %vm605_vm0 = vmmov 0   ;;  %v484_v1 = vld [vmem:[#allocation4] sm:$0xff]   ;;  %vm105_vm1 = vcmask 1043456  }
  0x49   :  { %428 = vmatprep.subr.bf16.mxu0 %v604_v0  ;;  %432 = vmatprep.mubr.msk.bf16.mxu0 %vm605_vm0, %v604_v0  ;;  %v485_v2 = vld [vmem:[#allocation4 + $0x8] ss:$0 sps:$4 sm:$0xff]   ;;  %v80_v3 = vld [vmem:[#allocation2] sm:$0xff]  ;;  %v486_v4 = vld [vmem:[#allocation6] sm:$0xff]   ;;  %vm101_vm2 = vcmask 195584   ;;  %vm376_vm3 = vcmask 31744  }
  0x4a   :  { %436 = vmatprep.subr.bf16.mxu1 %v604_v0  ;;  %452 = vmatprep.mubr.msk.bf16.mxu1 %vm605_vm0, %v604_v0  ;;  %v107_v5 = vsel %vm105_vm1, %v485_v2, 0  ;;  %v487_v6 = vld [vmem:[#allocation6 + $0x8] sm:$0xff]   ;;  %v81_v7 = vpack.c.bf16 %v80_v3, %v80_v3  ;;  %v488_v8 = vld [vmem:[#allocation6 + $0x10] sm:$0xff]   ;;  %v489_v9 = vld [vmem:[#allocation6 + $0x18] sm:$0xff]  }
  0x4b   :  { %429 = vmatpush3.bf16.msra.mxu0 %v484_v1  ;;  %437 = vmatpush3.bf16.msra.mxu1 %v486_v4  ;;  %v490_v10 = vld [vmem:[#allocation6 + $0x20] sm:$0xff]   ;;  %v491_v11 = vld [vmem:[#allocation6 + $0x28] sm:$0xff]   ;;  %v492_v12 = vld [vmem:[#allocation6 + $0x30] sm:$0xff]  }
  0x4c   :  { %430 = vmatprep.subr.bf16.mxu0 %v604_v0  ;;  %438 = vmatprep.subr.bf16.mxu1 %v604_v0  ;;  %v493_v13 = vld [vmem:[#allocation6 + $0x38] sm:$0xff]   ;;  %v494_v14 = vld [vmem:[#allocation7] sm:$0xff]   ;;  %v495_v15 = vld [vmem:[#allocation7 + $0x8] sm:$0xff]  }
  0x4d   :  { %v496_v16 = vld [vmem:[#allocation7 + $0x10] sm:$0xff]   ;;  %v497_v17 = vld [vmem:[#allocation7 + $0x18] sm:$0xff]   ;;  %v498_v18 = vld [vmem:[#allocation7 + $0x20] sm:$0xff]  }
  0x4e   :  { %v499_v19 = vld [vmem:[#allocation7 + $0x28] sm:$0xff]   ;;  %v500_v28 = vld [vmem:[#allocation7 + $0x30] sm:$0xff]   ;;  %v501_v29 = vld [vmem:[#allocation7 + $0x38] sm:$0xff]  }
  0x4f   :  { %431 = vmatpush3.bf16.msra.mxu0 %v107_v5  ;;  %439 = vmatpush3.bf16.msra.mxu1 %v487_v6  ;;  %v385_v20 = vld [vmem:[%s741_s2] ss:$0 sm:$0xff] }
  0x50   :  { %456 = vmatprep.subr.bf16.mxu0 %v604_v0  ;;  %440 = vmatprep.subr.bf16.mxu1 %v604_v0  ;;  %v389_v30 = vld [vmem:[%s743_s4] ss:$0 sm:$0xff] }
  0x51   :  { %v398_v38 = vld [vmem:[%s745_s6] ss:$0 sm:$0xff] }
  0x52   :  { %433 = vmatmul.mubr.msk.bf16.vlgmr.msra.gmra.mrb[0].mxu0 %vm101_vm2, %v81_v7 }
  0x53   :  { %472 = vmatprep.mubr.msk.bf16.mxu0 %vm605_vm0, %v604_v0  ;;  %441 = vmatpush3.bf16.msra.mxu1 %v488_v8 }
  0x54   :  { %442 = vmatprep.subr.bf16.mxu1 %v604_v0  ;;  %457 = vmatpush3.bf16.msra.mxu0 %v494_v14 }
  0x55   :  { %458 = vmatprep.subr.bf16.mxu0 %v604_v0 }
  0x57   :  { %443 = vmatpush3.bf16.msra.mxu1 %v489_v9 }
  0x58   :  { %444 = vmatprep.subr.bf16.mxu1 %v604_v0  ;;  %459 = vmatpush3.bf16.msra.mxu0 %v495_v15 }
  0x59   :  { %460 = vmatprep.subr.bf16.mxu0 %v604_v0 }
  0x5b   :  { %445 = vmatpush3.bf16.msra.mxu1 %v490_v10 }
  0x5c   :  { %446 = vmatprep.subr.bf16.mxu1 %v604_v0  ;;  %461 = vmatpush3.bf16.msra.mxu0 %v496_v16 }
  0x5d   :  { %462 = vmatprep.subr.bf16.mxu0 %v604_v0 }
  0x5f   :  { %447 = vmatpush3.bf16.msra.mxu1 %v491_v11 }
  0x60   :  { %448 = vmatprep.subr.bf16.mxu1 %v604_v0  ;;  %463 = vmatpush3.bf16.msra.mxu0 %v497_v17 }
  0x61   :  { %464 = vmatprep.subr.bf16.mxu0 %v604_v0 }
  0x63   :  { %449 = vmatpush3.bf16.msra.mxu1 %v492_v12 }
  0x64   :  { %450 = vmatprep.subr.bf16.mxu1 %v604_v0  ;;  %465 = vmatpush3.bf16.msra.mxu0 %v498_v18 }
  0x65   :  { %466 = vmatprep.subr.bf16.mxu0 %v604_v0 }
  0x67   :  { %451 = vmatpush3.bf16.msra.mxu1 %v493_v13 }
  0x68   :  { %467 = vmatpush3.bf16.msra.mxu0 %v499_v19 }
  0x69   :  { %468 = vmatprep.subr.bf16.mxu0 %v604_v0 }
  0x6c   :  { %469 = vmatpush3.bf16.msra.mxu0 %v500_v28 }
  0x6d   :  { %470 = vmatprep.subr.bf16.mxu0 %v604_v0 }
  0x70   :  { %471 = vmatpush3.bf16.msra.mxu0 %v501_v29 }
 0x125   :  { %v143_v21 = vpop.f32.mrb[0].mxu0 }
 0x126   :  { %v144_v22 = vadd.f32 %v385_v20, %v143_v21  ;;  %v434_v23 = vpop.f32.mrb[1].mxu0 }
 0x127   :  { %v146_v24 = vpop.f32.mrb[2].mxu0 }
 0x128   :  { %v149_v25 = vmax.f32 %v144_v22, 0.0  ;;  %v435_v26 = vpop.f32.mrb[3].mxu0 }
 0x12a   :  { %v150_v27 = vpack.c.bf16 %v149_v25, %v149_v25 }
 0x12c   :  { %453 = vmatmul.mubr.bf16.vlgmr.msra.gmra.mrb[0].mxu1 %v150_v27 }
 0x1ff   :  { %v256_v31 = vpop.f32.mrb[0].mxu1 }
 0x200   :  { %v257_v32 = vadd.f32 %v389_v30, %v256_v31  ;;  %v454_v33 = vpop.f32.mrb[1].mxu1 }
 0x201   :  { %v259_v34 = vpop.f32.mrb[2].mxu1 }
 0x202   :  { %v262_v35 = vmax.f32 %v257_v32, 0.0  ;;  %v455_v36 = vpop.f32.mrb[3].mxu1 }
 0x204   :  { %v263_v37 = vpack.c.bf16 %v262_v35, %v262_v35 }
 0x206   :  { %473 = vmatmul.mubr.bf16.vlgmr.msra.gmra.mrb[4].mxu0 %v263_v37 }
 0x2d9   :  { %v369_v39 = vpop.f32.mrb[4].mxu0 }
 0x2da   :  { %v370_v40 = vadd.f32 %v398_v38, %v369_v39  ;;  %v474_v41 = vpop.f32.mrb[5].mxu0 }
 0x2db   :  { %v372_v42 = vpop.f32.mrb[6].mxu0 }
 0x2dc   :  { %502 = vtanh.f32 %v370_v40  ;;  %v475_v43 = vpop.f32.mrb[7].mxu0 }
 0x2e6   :  { %v503_v44 = vpop.eup %502 }
 0x2e7   :  { %377 = vst.msk [vmem:[%s746_s7] sm:$0xff] %vm376_vm3, %v503_v44 }
 0x2e8   :  { %382 = vsyncpa [#allocation3], 1 }
 0x2e9   :  { %383 = vsyncpa [#allocation5], 1 }
 0x2ea   :  { %384 = vsyncpa [#allocation8], 1 }

</bundles_post_ra>
